<compile_context>
chip_gen: v5e
topology: v5e:2x2
jax: 0.10.0
libtpu: 0.0.40
codegen_flags: <defaults>
</compile_context>

<pallas_src>
import functools

import jax
import jax.numpy as jnp
from jax.experimental import pallas as pl
from jax.experimental.pallas import tpu as pltpu

LANE = 128  # TPU lane width: last-dim padding target


def _round_up(n, m):
    return ((n + m - 1) // m) * m


def _fused_mlp_kernel(x_ref, w_in_ref, *rest, num_hidden, hid_p, out_p):
    """One batch tile of the full MLP; activations never leave the chip."""
    if num_hidden > 0:
        w_hid_ref, w_out_ref, b_ref, o_ref = rest
    else:
        w_hid_ref = None
        w_out_ref, b_ref, o_ref = rest

    wdt = w_in_ref.dtype  # bf16 compute dtype (MXU native), f32 accumulate

    # input layer + ReLU
    h = jnp.dot(x_ref[...], w_in_ref[...], preferred_element_type=jnp.float32)
    h = jnp.maximum(h + b_ref[0:1, :hid_p], 0.0)

    # hidden layers + ReLU (static unroll: num_hidden is small and known at trace time)
    for l in range(num_hidden):
        h = jnp.dot(h.astype(wdt), w_hid_ref[l], preferred_element_type=jnp.float32)
        h = jnp.maximum(h + b_ref[l + 1:l + 2, :hid_p], 0.0)

    # output layer (no activation)
    y = jnp.dot(h.astype(wdt), w_out_ref[...], preferred_element_type=jnp.float32)
    y = y + b_ref[num_hidden + 1:num_hidden + 2, :out_p]
    o_ref[...] = y.astype(o_ref.dtype)


def init_flexible_nn_params(key, input_size, hidden_size, num_layers, output_size=500):
    """Deterministic init mimicking torch.nn.Linear default (uniform(-1/sqrt(fan_in), ...)).

    Weights stored as [F_in, F_out] (PyTorch (out, in) transposed), so each layer is
    y = x @ W + b.  Returns a list of (w, b) f32 pairs (the 'PyTorch-equivalent' params).
    """
    params = []
    sizes = [(input_size, hidden_size)]
    sizes += [(hidden_size, hidden_size) for _ in range(num_layers)]
    sizes += [(hidden_size, output_size)]
    for fan_in, fan_out in sizes:
        key, kw, kb = jax.random.split(key, 3)
        bound = 1.0 / jnp.sqrt(jnp.float32(fan_in))
        w = jax.random.uniform(kw, (fan_in, fan_out), jnp.float32, -bound, bound)
        b = jax.random.uniform(kb, (1, fan_out), jnp.float32, -bound, bound)
        params.append((w, b))
    return params


def prepare_flexible_nn_params(params, weight_dtype=jnp.bfloat16):
    """One-time packing: lane-pad, stack, and cast weights.

    Done once at init (not per forward call) so the forward pass only pads x.
    Zero-padding of weights/biases keeps padded columns exactly zero through the
    ReLU network, so the math is unchanged (padded outputs are sliced off).
    """
    w_in, b_in = params[0]
    hidden = params[1:-1]
    w_out, b_out = params[-1]
    input_size, hidden_size = w_in.shape
    output_size = w_out.shape[1]
    num_hidden = len(hidden)

    in_p = _round_up(input_size, LANE)
    hid_p = _round_up(hidden_size, LANE)
    out_p = _round_up(output_size, LANE)
    bcol = max(hid_p, out_p)

    def pad2(a, rows, cols):
        return jnp.pad(a, ((0, rows - a.shape[0]), (0, cols - a.shape[1])))

    w_in_p = pad2(w_in, in_p, hid_p).astype(weight_dtype)
    w_out_p = pad2(w_out, hid_p, out_p).astype(weight_dtype)
    w_hid_p = None
    if num_hidden > 0:
        w_hid_p = jnp.stack([pad2(w, hid_p, hid_p) for w, _ in hidden]).astype(weight_dtype)

    # All biases packed into ONE [num_hidden + 2, bcol] f32 array (fewer DMA descriptors).
    bias_rows = [pad2(b_in, 1, bcol)]
    bias_rows += [pad2(b, 1, bcol) for _, b in hidden]
    bias_rows += [pad2(b_out, 1, bcol)]
    b_all = jnp.concatenate(bias_rows, axis=0).astype(jnp.float32)

    return dict(
        w_in=w_in_p, w_hid=w_hid_p, w_out=w_out_p, b_all=b_all,
        input_size=input_size, hidden_size=hidden_size, output_size=output_size,
        num_hidden=num_hidden, in_p=in_p, hid_p=hid_p, out_p=out_p,
        weight_dtype=weight_dtype,
    )


def flexible_nn_forward(packed, x):
    """packed: output of prepare_flexible_nn_params; x: [B, input_size] -> [B, output_size]."""
    B, input_size = x.shape
    assert input_size == packed["input_size"]
    in_p, hid_p, out_p = packed["in_p"], packed["hid_p"], packed["out_p"]
    num_hidden = packed["num_hidden"]
    output_size = packed["output_size"]
    wdt = packed["weight_dtype"]
    out_dtype = x.dtype

    # ---- batch tiling -----------------------------------------------------------
    if B <= 128:
        b_pad = _round_up(B, 8)
        bm = b_pad                      # single batch tile -> grid of 1
    else:
        bm = 256 if B >= 256 else 128   # 256-row tiles fill v6e/v7x 256x256 MXUs
        b_pad = _round_up(B, bm)

    # Only the activations are padded per call (weights were packed once at init).
    # Cast x to the bf16 compute dtype: halves its DMA bytes, MXU-native input.
    x_p = jnp.pad(x, ((0, b_pad - B), (0, in_p - input_size))).astype(wdt)

    grid = (b_pad // bm,)
    const2 = lambda i: (0, 0)
    const3 = lambda i: (0, 0, 0)
    # Weight/bias blocks never change across the grid -> single VMEM buffer.
    wbuf = dict(pipeline_mode=pl.Buffered(1))

    in_specs = [
        pl.BlockSpec((bm, in_p), lambda i: (i, 0)),                     # batch tile of x
        pl.BlockSpec((in_p, hid_p), const2, **wbuf),                    # input-layer W
    ]
    args = [x_p, packed["w_in"]]
    if num_hidden > 0:
        in_specs.append(pl.BlockSpec((num_hidden, hid_p, hid_p), const3, **wbuf))
        args.append(packed["w_hid"])
    bcol = packed["b_all"].shape[1]
    in_specs += [
        pl.BlockSpec((hid_p, out_p), const2, **wbuf),                   # output-layer W
        pl.BlockSpec((num_hidden + 2, bcol), const2, **wbuf),           # all biases (f32)
    ]
    args += [packed["w_out"], packed["b_all"]]

    # ---- cost / VMEM sizing -------------------------------------------------------
    w_itemsize = jnp.dtype(wdt).itemsize
    weight_elems = in_p * hid_p + num_hidden * hid_p * hid_p + hid_p * out_p
    weight_bytes = weight_elems * w_itemsize
    bias_bytes = (num_hidden + 2) * bcol * 4
    act_bytes = bm * (2 * in_p * w_itemsize + 2 * out_p * 4 + 2 * hid_p * 4)
    needed = weight_bytes + bias_bytes + act_bytes
    vmem_limit = int(min(max(2 * needed + (1 << 20), 8 << 20), 64 << 20))

    flops = 2 * b_pad * (in_p * hid_p + num_hidden * hid_p * hid_p + hid_p * out_p)
    bytes_accessed = (b_pad * in_p * w_itemsize + b_pad * out_p * 4
                      + weight_bytes + bias_bytes)

    out_padded = pl.pallas_call(
        functools.partial(_fused_mlp_kernel,
                          num_hidden=num_hidden, hid_p=hid_p, out_p=out_p),
        out_shape=jax.ShapeDtypeStruct((b_pad, out_p), out_dtype),
        grid_spec=pltpu.PrefetchScalarGridSpec(
            num_scalar_prefetch=0,
            grid=grid,
            in_specs=in_specs,
            out_specs=pl.BlockSpec((bm, out_p), lambda i: (i, 0)),
        ),
        compiler_params=pltpu.CompilerParams(
            dimension_semantics=("parallel",),
            vmem_limit_bytes=vmem_limit,
        ),
        cost_estimate=pl.CostEstimate(
            flops=flops, transcendentals=0, bytes_accessed=bytes_accessed),
    )(*args)

    # slice off the batch / lane padding
    return out_padded[:B, :output_size]


if __name__ == "__main__":
    input_size = 32
    hidden_size = 32
    num_layers = 2
    batch = 16

    key = jax.random.PRNGKey(0)
    key_params, key_x = jax.random.split(key)
    params = init_flexible_nn_params(key_params, input_size, hidden_size, num_layers)
    packed = prepare_flexible_nn_params(params)   # one-time pad/stack/cast (hoisted out of forward)
    x = jax.random.normal(key_x, (batch, input_size), jnp.float32)

    out = flexible_nn_forward(packed, x)
    out = jax.block_until_ready(out)

    # f32 reference in plain JAX (kernel uses bf16 weights -> loosened tolerance)
    ref = jnp.maximum(x @ params[0][0] + params[0][1], 0.0)
    for w, b in params[1:-1]:
        ref = jnp.maximum(ref @ w + b, 0.0)
    ref = ref @ params[-1][0] + params[-1][1]

    assert out.shape == (batch, 500)
    max_err = float(jnp.max(jnp.abs(out - ref)))
    assert max_err < 5e-2, f"max abs error {max_err}"

    print("KERNEL_OK")
</pallas_src>

<mosaic_0001>
module attributes {stable_mosaic.version = 11 : i64} {
  func.func @_fused_mlp_kernel(%arg0: i32, %arg1: memref<16x128xbf16, #tpu.memory_space<vmem>>, %arg2: memref<128x128xbf16, #tpu.memory_space<vmem>>, %arg3: memref<2x128x128xbf16, #tpu.memory_space<vmem>>, %arg4: memref<128x512xbf16, #tpu.memory_space<vmem>>, %arg5: memref<4x512xf32, #tpu.memory_space<vmem>>, %arg6: memref<16x512xf32, #tpu.memory_space<vmem>>) attributes {dimension_semantics = [#tpu.dimension_semantics<parallel>], iteration_bounds = array<i64: 1>, scalar_prefetch = 0 : i64, scratch_operands = 0 : i64, tpu.core_type = #tpu.core_type<tc>, window_params = [{transform_indices = @transform_0, window_bounds = array<i64: 16, 128>}, {pipeline_mode = #tpu.pipeline_mode<synchronous>, transform_indices = @transform_1, window_bounds = array<i64: 128, 128>}, {pipeline_mode = #tpu.pipeline_mode<synchronous>, transform_indices = @transform_2, window_bounds = array<i64: 2, 128, 128>}, {pipeline_mode = #tpu.pipeline_mode<synchronous>, transform_indices = @transform_3, window_bounds = array<i64: 128, 512>}, {pipeline_mode = #tpu.pipeline_mode<synchronous>, transform_indices = @transform_4, window_bounds = array<i64: 4, 512>}, {transform_indices = @transform_5, window_bounds = array<i64: 16, 512>}]} {
    %c0 = arith.constant 0 : index
    %c0_0 = arith.constant 0 : index
    %0 = vector.load %arg1[%c0, %c0_0] : memref<16x128xbf16, #tpu.memory_space<vmem>>, vector<16x128xbf16>
    %c0_1 = arith.constant 0 : index
    %c0_2 = arith.constant 0 : index
    %1 = vector.load %arg2[%c0_1, %c0_2] : memref<128x128xbf16, #tpu.memory_space<vmem>>, vector<128x128xbf16>
    %cst = arith.constant dense<0.000000e+00> : vector<16x128xf32>
    %2 = tpu.matmul %0, %1, %cst {dimension_numbers = #tpu.dot_dimension_numbers<[1], [0], [0], [1], [0, 0, 1, 1], [], []>} : vector<16x128xbf16>, vector<128x128xbf16>, vector<16x128xf32> -> vector<16x128xf32>
    %c0_3 = arith.constant 0 : index
    %c0_4 = arith.constant 0 : index
    %3 = vector.load %arg5[%c0_3, %c0_4] : memref<4x512xf32, #tpu.memory_space<vmem>>, vector<1x128xf32>
    %4 = vector.broadcast %3 : vector<1x128xf32> to vector<16x128xf32>
    %5 = arith.addf %2, %4 : vector<16x128xf32>
    %cst_5 = arith.constant 0.000000e+00 : f32
    %6 = vector.broadcast %cst_5 : f32 to vector<16x128xf32>
    %7 = arith.maximumf %5, %6 : vector<16x128xf32>
    %8 = arith.truncf %7 : vector<16x128xf32> to vector<16x128xbf16>
    %c0_6 = arith.constant 0 : index
    %c0_7 = arith.constant 0 : index
    %c0_8 = arith.constant 0 : index
    %9 = vector.load %arg3[%c0_6, %c0_7, %c0_8] : memref<2x128x128xbf16, #tpu.memory_space<vmem>>, vector<1x128x128xbf16>
    %10 = vector.shape_cast %9 : vector<1x128x128xbf16> to vector<128x128xbf16>
    %cst_9 = arith.constant dense<0.000000e+00> : vector<16x128xf32>
    %11 = tpu.matmul %8, %10, %cst_9 {dimension_numbers = #tpu.dot_dimension_numbers<[1], [0], [0], [1], [0, 0, 1, 1], [], []>} : vector<16x128xbf16>, vector<128x128xbf16>, vector<16x128xf32> -> vector<16x128xf32>
    %c1 = arith.constant 1 : index
    %c0_10 = arith.constant 0 : index
    %12 = vector.load %arg5[%c1, %c0_10] : memref<4x512xf32, #tpu.memory_space<vmem>>, vector<1x128xf32>
    %13 = vector.broadcast %12 : vector<1x128xf32> to vector<16x128xf32>
    %14 = arith.addf %11, %13 : vector<16x128xf32>
    %cst_11 = arith.constant 0.000000e+00 : f32
    %15 = vector.broadcast %cst_11 : f32 to vector<16x128xf32>
    %16 = arith.maximumf %14, %15 : vector<16x128xf32>
    %17 = arith.truncf %16 : vector<16x128xf32> to vector<16x128xbf16>
    %c1_12 = arith.constant 1 : index
    %c0_13 = arith.constant 0 : index
    %c0_14 = arith.constant 0 : index
    %18 = vector.load %arg3[%c1_12, %c0_13, %c0_14] : memref<2x128x128xbf16, #tpu.memory_space<vmem>>, vector<1x128x128xbf16>
    %19 = vector.shape_cast %18 : vector<1x128x128xbf16> to vector<128x128xbf16>
    %cst_15 = arith.constant dense<0.000000e+00> : vector<16x128xf32>
    %20 = tpu.matmul %17, %19, %cst_15 {dimension_numbers = #tpu.dot_dimension_numbers<[1], [0], [0], [1], [0, 0, 1, 1], [], []>} : vector<16x128xbf16>, vector<128x128xbf16>, vector<16x128xf32> -> vector<16x128xf32>
    %c2 = arith.constant 2 : index
    %c0_16 = arith.constant 0 : index
    %21 = vector.load %arg5[%c2, %c0_16] : memref<4x512xf32, #tpu.memory_space<vmem>>, vector<1x128xf32>
    %22 = vector.broadcast %21 : vector<1x128xf32> to vector<16x128xf32>
    %23 = arith.addf %20, %22 : vector<16x128xf32>
    %cst_17 = arith.constant 0.000000e+00 : f32
    %24 = vector.broadcast %cst_17 : f32 to vector<16x128xf32>
    %25 = arith.maximumf %23, %24 : vector<16x128xf32>
    %26 = arith.truncf %25 : vector<16x128xf32> to vector<16x128xbf16>
    %c0_18 = arith.constant 0 : index
    %c0_19 = arith.constant 0 : index
    %27 = vector.load %arg4[%c0_18, %c0_19] : memref<128x512xbf16, #tpu.memory_space<vmem>>, vector<128x512xbf16>
    %cst_20 = arith.constant dense<0.000000e+00> : vector<16x512xf32>
    %28 = tpu.matmul %26, %27, %cst_20 {dimension_numbers = #tpu.dot_dimension_numbers<[1], [0], [0], [1], [0, 0, 1, 1], [], []>} : vector<16x128xbf16>, vector<128x512xbf16>, vector<16x512xf32> -> vector<16x512xf32>
    %c3 = arith.constant 3 : index
    %c0_21 = arith.constant 0 : index
    %29 = vector.load %arg5[%c3, %c0_21] : memref<4x512xf32, #tpu.memory_space<vmem>>, vector<1x512xf32>
    %30 = vector.broadcast %29 : vector<1x512xf32> to vector<16x512xf32>
    %31 = arith.addf %28, %30 : vector<16x512xf32>
    %c0_22 = arith.constant 0 : index
    %c0_23 = arith.constant 0 : index
    %32 = vector.load %arg6[%c0_22, %c0_23] : memref<16x512xf32, #tpu.memory_space<vmem>>, vector<16x512xf32>
    tpu.vector_store %arg6[%c0_22, %c0_23], %31 {strides = array<i32>} : memref<16x512xf32, #tpu.memory_space<vmem>>, vector<16x512xf32>,
    return
  }
  func.func @transform_0(%arg0: i32) -> (i32, i32) {
    %c0_i32 = arith.constant 0 : i32
    %c0_i32_0 = arith.constant 0 : i32
    return %arg0, %c0_i32 : i32, i32
  }
  func.func @transform_1(%arg0: i32) -> (i32, i32) {
    %c0_i32 = arith.constant 0 : i32
    %c0_i32_0 = arith.constant 0 : i32
    %c0_i32_1 = arith.constant 0 : i32
    return %c0_i32, %c0_i32_0 : i32, i32
  }
  func.func @transform_2(%arg0: i32) -> (i32, i32, i32) {
    %c0_i32 = arith.constant 0 : i32
    %c0_i32_0 = arith.constant 0 : i32
    %c0_i32_1 = arith.constant 0 : i32
    %c0_i32_2 = arith.constant 0 : i32
    return %c0_i32, %c0_i32_0, %c0_i32_1 : i32, i32, i32
  }
  func.func @transform_3(%arg0: i32) -> (i32, i32) {
    %c0_i32 = arith.constant 0 : i32
    %c0_i32_0 = arith.constant 0 : i32
    %c0_i32_1 = arith.constant 0 : i32
    return %c0_i32, %c0_i32_0 : i32, i32
  }
  func.func @transform_4(%arg0: i32) -> (i32, i32) {
    %c0_i32 = arith.constant 0 : i32
    %c0_i32_0 = arith.constant 0 : i32
    %c0_i32_1 = arith.constant 0 : i32
    return %c0_i32, %c0_i32_0 : i32, i32
  }
  func.func @transform_5(%arg0: i32) -> (i32, i32) {
    %c0_i32 = arith.constant 0 : i32
    %c0_i32_0 = arith.constant 0 : i32
    return %arg0, %c0_i32 : i32, i32
  }
}

</mosaic_0001>

<bundles_post_ra>
// kernel: tpu_custom_call.1
= control target key start
LH: loop header
LB: loop body
LE: loop exit
PB: predicated region body
PF: predicated region fallthrough
CT: control target
= control target key end

     0   :  { %10 = vsyncpa [#allocation3], 0  ;;  %s1155_s0 = inlined_call_operand.hbm [shape: bf16[16,128], index: 0, kind: input, shape index: {}]   ;;  %s1156_s1 = inlined_call_operand.hbm [shape: bf16[128,128], index: 1, kind: input, shape index: {}]   ;;  %s1157_s2 = inlined_call_operand.hbm [shape: bf16[2,128,128], index: 2, kind: input, shape index: {}]   ;;  %s1158_s3 = inlined_call_operand.hbm [shape: bf16[128,512], index: 3, kind: input, shape index: {}]   ;;  %s1159_s4 = inlined_call_operand.hbm [shape: f32[4,512], index: 4, kind: input, shape index: {}]   ;;  %s1160_s5 = inlined_call_operand.hbm [shape: f32[16,512], index: 5, kind: output, shape index: {}]  }
   0x1   :  { %11 = vsyncpa [#allocation6], 0 }
   0x2   :  { %12 = vsyncpa [#allocation9], 0 }
   0x3   :  { %13 = vsyncpa [#allocation4], 0  ;;  %s31_s20 = sshll.u32 %s1156_s1, 4  ;;  %s1095_s21 = smov [#allocation5]   ;;  %s32_s20 = int_to_ptr.hbm [resolvable:$true] %s31_s20 }
   0x4   :  { %s33_s22 = sshll.u32 %s1095_s21, 4  ;;  %s57_s25 = sshll.u32 %s1158_s3, 4  ;;  %s34_s22 = int_to_ptr.vmem [resolvable:$true] %s33_s22  ;;  %s58_s25 = int_to_ptr.hbm [resolvable:$true] %s57_s25 }
   0x5   :  { %s1096_s26 = smov 64   ;;  %s1097_s27 = smov 4  }
   0x6   :  { %39 = dma.hbm_to_vmem [thread:$0]  %s32_s20, 1024, %s34_s22, [#allocation6], %s1096_s26, %s1096_s26, %s1097_s27  }
   0x7   :  { %s1098_s28 = smov [#allocation8]   ;;  %s1099_s30 = smov 256  }
   0x8   :  { %s59_s29 = sshll.u32 %s1098_s28, 4  ;;  %s1100_s6 = smov 16   ;;  %s60_s29 = int_to_ptr.vmem [resolvable:$true] %s59_s29 }
   0x9   :  { %65 = dma.hbm_to_vmem [thread:$0]  %s58_s25, 4096, %s60_s29, [#allocation9], %s1099_s30, %s1099_s30, %s1100_s6  }
   0xa   :  { %s18_s8 = sshll.u32 %s1155_s0, 4  ;;  %s1101_s9 = smov [#allocation2]   ;;  %s19_s8 = int_to_ptr.hbm [resolvable:$true] %s18_s8 }
   0xb   :  { %s20_s10 = sshll.u32 %s1101_s9, 4  ;;  %s44_s12 = sshll.u32 %s1157_s2, 4  ;;  %s21_s10 = int_to_ptr.vmem [resolvable:$true] %s20_s10  ;;  %s45_s12 = int_to_ptr.hbm [resolvable:$true] %s44_s12 }
   0xc   :  { %26 = dma.hbm_to_vmem [thread:$0]  %s19_s8, 128, %s21_s10, [#allocation3], %s1096_s26, %s1096_s26, %s1097_s27  }
   0xd   :  { %s1102_s13 = smov [#allocation7]   ;;  %s71_s17 = sshll.u32 %s1159_s4, 4  ;;  %s72_s17 = int_to_ptr.hbm [resolvable:$true] %s71_s17 }
   0xe   :  { %s46_s14 = sshll.u32 %s1102_s13, 4  ;;  %s1103_s0 = smov [#allocation10]   ;;  %s47_s14 = int_to_ptr.vmem [resolvable:$true] %s46_s14 }
   0xf   :  { %52 = dma.hbm_to_vmem [thread:$0]  %s45_s12, 2048, %s47_s14, [#allocation6], %s1096_s26, %s1096_s26, %s1097_s27  }
  0x10   :  { %s73_s18 = sshll.u32 %s1103_s0, 4  ;;  %s74_s18 = int_to_ptr.vmem [resolvable:$true] %s73_s18 }
  0x11   :  { %76 = dma.hbm_to_vmem [thread:$0]  %s72_s17, 256, %s74_s18, [#allocation9]  }
  0x12   :  { %1087 = dma.done.wait [#allocation3], 128  }
  0x13   :  { %1088 = vsyncadd [#allocation3], 4294967168 }
  0x14   :  { %1089 = dma.done.wait [#allocation6], 3072  }
  0x15   :  { %1090 = vsyncadd [#allocation6], 4294964224 }
  0x16   :  { %1091 = dma.done.wait [#allocation9], 4352  }
  0x17   :  { %1092 = vsyncadd [#allocation9], 4294962944  ;;  %v879_v0 = vld [vmem:[#allocation5 + $0x38] sm:$0xff]  ;;  %v878_v1 = vld [vmem:[#allocation5 + $0x30] sm:$0xff]  ;;  %s1104_s2 = smov [#allocation11]   ;;  %s628_s21 = sshll.u32 %s1160_s5, 4  ;;  %s629_s21 = int_to_ptr.hbm [resolvable:$true] %s628_s21 }
  0x18   :  { %171 = vmatpush.bf16.msra.mxu0 %v879_v0  ;;  %v887_v2 = vld [vmem:[#allocation7 + $0x38] sm:$0xff]  ;;  %v886_v3 = vld [vmem:[#allocation7 + $0x30] sm:$0xff]  ;;  %v877_v4 = vld [vmem:[#allocation5 + $0x28] sm:$0xff]  ;;  %s626_s4 = sshll.u32 %s1104_s2, 4  ;;  %s1105_s22 = smov 512   ;;  %s627_s4 = int_to_ptr.vmem [resolvable:$true] %s626_s4 }
  0x19   :  { %254 = vmatpush.bf16.msra.mxu1 %v887_v2  ;;  %v885_v5 = vld [vmem:[#allocation7 + $0x28] sm:$0xff]  ;;  %v876_v6 = vld [vmem:[#allocation5 + $0x20] sm:$0xff]  ;;  %v875_v8 = vld [vmem:[#allocation5 + $0x18] sm:$0xff]  ;;  %s1106_s23 = smov 32  }
  0x1a   :  { %v884_v7 = vld [vmem:[#allocation7 + $0x20] sm:$0xff]  ;;  %v874_v9 = vld [vmem:[#allocation5 + $0x10] sm:$0xff]  ;;  %v873_v10 = vld [vmem:[#allocation5 + $0x8] sm:$0xff] }
  0x1b   :  { %v872_v11 = vld [vmem:[#allocation5] sm:$0xff]  ;;  %v871_v12 = vld [vmem:[#allocation2] sm:$0xff]  ;;  %v882_v14 = vld [vmem:[#allocation7 + $0x10] sm:$0xff] }
  0x1c   :  { %172 = vmatpush.bf16.msra.mxu0 %v878_v1  ;;  %v883_v13 = vld [vmem:[#allocation7 + $0x18] sm:$0xff]  ;;  %v881_v15 = vld [vmem:[#allocation7 + $0x8] sm:$0xff]  ;;  %v880_v16 = vld [vmem:[#allocation7] sm:$0xff] }
  0x1d   :  { %255 = vmatpush.bf16.msra.mxu1 %v886_v3  ;;  %v895_v17 = vld [vmem:[#allocation7 + $0x78] sm:$0xff]  ;;  %v894_v18 = vld [vmem:[#allocation7 + $0x70] sm:$0xff]  ;;  %v893_v19 = vld [vmem:[#allocation7 + $0x68] sm:$0xff] }
  0x1e   :  { %338 = vmatpush.bf16.msra.mxu2 %v895_v17  ;;  %v892_v20 = vld [vmem:[#allocation7 + $0x60] sm:$0xff]  ;;  %v891_v29 = vld [vmem:[#allocation7 + $0x58] sm:$0xff]  ;;  %v890_v30 = vld [vmem:[#allocation7 + $0x50] sm:$0xff] }
  0x1f   :  { %v940_v22 = vld [vmem:[#allocation10] ss:$0 sm:$0xff]  ;;  %v889_v31 = vld [vmem:[#allocation7 + $0x48] sm:$0xff]  ;;  %v926_v34 = vld [vmem:[#allocation8 + $0xec] sm:$0xf0] }
  0x20   :  { %173 = vmatpush.bf16.msra.mxu0 %v877_v4  ;;  %v888_v32 = vld [vmem:[#allocation7 + $0x40] sm:$0xff]  ;;  %v859_v37 = vld [vmem:[#allocation8 + $0xf0] sm:$0xf0]  ;;  %v865_v38 = vld [vmem:[#allocation8 + $0xe8] sm:$0xf] }
  0x21   :  { %256 = vmatpush.bf16.msra.mxu1 %v885_v5  ;;  %v857_v33 = vld [vmem:[#allocation8 + $0xe0] sm:$0xf]  ;;  %v924_v35 = vld [vmem:[#allocation8 + $0xe4] sm:$0xf]  ;;  %v927_v39 = vld [vmem:[#allocation8 + $0xf4] sm:$0xf0] }
  0x22   :  { %339 = vmatpush.bf16.msra.mxu2 %v894_v18  ;;  %v858_v36 = vor.u32 %v926_v34, %v857_v33  ;;  %v862_v40 = vor.u32 %v924_v35, %v859_v37  ;;  %v866_v41 = vor.u32 %v927_v39, %v865_v38  ;;  %v925_v42 = vld [vmem:[#allocation8 + $0xec] sm:$0xf]  ;;  %v867_v43 = vld [vmem:[#allocation8 + $0xf8] sm:$0xf0]  ;;  %v841_v44 = vld [vmem:[#allocation8 + $0xc0] sm:$0xf] }
  0x23   :  { %v870_v45 = vor.u32 %v925_v42, %v867_v43  ;;  %v922_v46 = vld [vmem:[#allocation8 + $0xcc] sm:$0xf0]  ;;  %v920_v47 = vld [vmem:[#allocation8 + $0xc4] sm:$0xf]  ;;  %v843_v48 = vld [vmem:[#allocation8 + $0xd0] sm:$0xf0] }
  0x24   :  { %174 = vmatpush.bf16.msra.mxu0 %v876_v6  ;;  %558 = vmatpush.bf16.msra.mxu3 %v858_v36  ;;  %v842_v49 = vor.u32 %v922_v46, %v841_v44  ;;  %v846_v50 = vor.u32 %v920_v47, %v843_v48  ;;  %v849_v51 = vld [vmem:[#allocation8 + $0xc8] sm:$0xf]  ;;  %v923_v52 = vld [vmem:[#allocation8 + $0xd4] sm:$0xf0]  ;;  %v921_v53 = vld [vmem:[#allocation8 + $0xcc] sm:$0xf] }
  0x25   :  { %257 = vmatpush.bf16.msra.mxu1 %v884_v7  ;;  %v850_v54 = vor.u32 %v923_v52, %v849_v51  ;;  %v851_v55 = vld [vmem:[#allocation8 + $0xd8] sm:$0xf0]  ;;  %v825_v56 = vld [vmem:[#allocation8 + $0xa0] sm:$0xf]  ;;  %v918_v57 = vld [vmem:[#allocation8 + $0xac] sm:$0xf0] }
  0x26   :  { %340 = vmatpush.bf16.msra.mxu2 %v893_v19  ;;  %v854_v58 = vor.u32 %v921_v53, %v851_v55  ;;  %v916_v59 = vld [vmem:[#allocation8 + $0xa4] sm:$0xf]  ;;  %v827_v60 = vld [vmem:[#allocation8 + $0xb0] sm:$0xf0]  ;;  %v833_v61 = vld [vmem:[#allocation8 + $0xa8] sm:$0xf]  ;;  %v826_v62 = vor.u32 %v918_v57, %v825_v56 }
  0x27   :  { %v919_v63 = vld [vmem:[#allocation8 + $0xb4] sm:$0xf0]  ;;  %v917_v0 = vld [vmem:[#allocation8 + $0xac] sm:$0xf]  ;;  %v835_v1 = vld [vmem:[#allocation8 + $0xb8] sm:$0xf0]  ;;  %v830_v2 = vor.u32 %v916_v59, %v827_v60 }
  0x28   :  { %175 = vmatpush.bf16.msra.mxu0 %v875_v8  ;;  %559 = vmatpush.bf16.msra.mxu3 %v842_v49  ;;  %v834_v3 = vor.u32 %v919_v63, %v833_v61  ;;  %v809_v4 = vld [vmem:[#allocation8 + $0x80] sm:$0xf]  ;;  %v914_v5 = vld [vmem:[#allocation8 + $0x8c] sm:$0xf0]  ;;  %v912_v6 = vld [vmem:[#allocation8 + $0x84] sm:$0xf]  ;;  %v838_v7 = vor.u32 %v917_v0, %v835_v1 }
  0x29   :  { %258 = vmatpush.bf16.msra.mxu1 %v883_v13  ;;  %v811_v8 = vld [vmem:[#allocation8 + $0x90] sm:$0xf0]  ;;  %v810_v13 = vor.u32 %v914_v5, %v809_v4  ;;  %v941_v18 = vld [vmem:[#allocation10 + $0x1] ss:$0 sm:$0xff]  ;;  %v909_v34 = vld [vmem:[#allocation8 + $0x6c] sm:$0xf] }
  0x2a   :  { %341 = vmatpush.bf16.msra.mxu2 %v892_v20  ;;  %v803_v35 = vld [vmem:[#allocation8 + $0x78] sm:$0xf0]  ;;  %v777_v37 = vld [vmem:[#allocation8 + $0x40] sm:$0xf]  ;;  %v906_v38 = vld [vmem:[#allocation8 + $0x4c] sm:$0xf0] }
  0x2b   :  { %v806_v36 = vor.u32 %v909_v34, %v803_v35  ;;  %v904_v39 = vld [vmem:[#allocation8 + $0x44] sm:$0xf]  ;;  %v785_v42 = vld [vmem:[#allocation8 + $0x48] sm:$0xf]  ;;  %v907_v43 = vld [vmem:[#allocation8 + $0x54] sm:$0xf0] }
  0x2c   :  { %176 = vmatpush.bf16.msra.mxu0 %v874_v9  ;;  %v817_v9 = vld [vmem:[#allocation8 + $0x88] sm:$0xf]  ;;  %560 = vmatpush.bf16.msra.mxu3 %v826_v62  ;;  %v905_v46 = vld [vmem:[#allocation8 + $0x4c] sm:$0xf]  ;;  %v787_v47 = vld [vmem:[#allocation8 + $0x58] sm:$0xf0] }
  0x2d   :  { %259 = vmatpush.bf16.msra.mxu1 %v882_v14  ;;  %v814_v14 = vor.u32 %v912_v6, %v811_v8  ;;  %v790_v48 = vor.u32 %v905_v46, %v787_v47  ;;  %v761_v49 = vld [vmem:[#allocation8 + $0x20] sm:$0xf]  ;;  %v900_v51 = vld [vmem:[#allocation8 + $0x24] sm:$0xf]  ;;  %v763_v53 = vld [vmem:[#allocation8 + $0x30] sm:$0xf0] }
  0x2e   :  { %342 = vmatpush.bf16.msra.mxu2 %v891_v29  ;;  %v795_v29 = vld [vmem:[#allocation8 + $0x70] sm:$0xf0]  ;;  %v903_v55 = vld [vmem:[#allocation8 + $0x34] sm:$0xf0]  ;;  %v766_v56 = vor.u32 %v900_v51, %v763_v53  ;;  %v771_v59 = vld [vmem:[#allocation8 + $0x38] sm:$0xf0] }
  0x2f   :  { %v745_v61 = vld [vmem:[#allocation8] sm:$0xf]  ;;  %v898_v62 = vld [vmem:[#allocation8 + $0xc] sm:$0xf0]  ;;  %v896_v63 = vld [vmem:[#allocation8 + $0x4] sm:$0xf] }
  0x30   :  { %177 = vmatpush.bf16.msra.mxu0 %v873_v10  ;;  %v915_v10 = vld [vmem:[#allocation8 + $0x94] sm:$0xf0]  ;;  %561 = vmatpush.bf16.msra.mxu3 %v810_v13  ;;  %v746_v0 = vor.u32 %v898_v62, %v745_v61  ;;  %v747_v1 = vld [vmem:[#allocation8 + $0x10] sm:$0xf0]  ;;  %v897_v6 = vld [vmem:[#allocation8 + $0xc] sm:$0xf] }
  0x31   :  { %260 = vmatpush.bf16.msra.mxu1 %v881_v15  ;;  %v818_v15 = vor.u32 %v915_v10, %v817_v9  ;;  %v750_v4 = vor.u32 %v896_v63, %v747_v1  ;;  %v942_v10 = vld [vmem:[#allocation10 + $0x2] ss:$0 sm:$0xff] }
  0x32   :  { %343 = vmatpush.bf16.msra.mxu2 %v890_v30  ;;  %v801_v30 = vld [vmem:[#allocation8 + $0x68] sm:$0xf] }
  0x34   :  { %178 = vmatpush.bf16.msra.mxu0 %v872_v11  ;;  %v913_v11 = vld [vmem:[#allocation8 + $0x8c] sm:$0xf] }
  0x35   :  { %261 = vmatpush.bf16.msra.mxu1 %v880_v16 }
  0x36   :  { %344 = vmatpush.bf16.msra.mxu2 %v889_v31  ;;  %v911_v31 = vld [vmem:[#allocation8 + $0x74] sm:$0xf0] }
  0x37   :  { %179 = vmatmul.bf16.vlgmr.msra.gmra.mxu0 %v871_v12  ;;  %v819_v12 = vld [vmem:[#allocation8 + $0x98] sm:$0xf0]  ;;  %v802_v33 = vor.u32 %v911_v31, %v801_v30 }
  0x38   :  { %572 = vmatpush.bf16.msrb.mxu0 %v862_v40  ;;  %v822_v16 = vor.u32 %v913_v11, %v819_v12  ;;  %v778_v40 = vor.u32 %v906_v38, %v777_v37 }
  0x39   :  { %586 = vmatpush.bf16.msrb.mxu1 %v866_v41  ;;  %v779_v41 = vld [vmem:[#allocation8 + $0x50] sm:$0xf0] }
  0x3a   :  { %345 = vmatpush.bf16.msra.mxu2 %v888_v32  ;;  %v782_v44 = vor.u32 %v904_v39, %v779_v41 }
  0x3c   :  { %573 = vmatpush.bf16.msrb.mxu0 %v846_v50  ;;  %v902_v50 = vld [vmem:[#allocation8 + $0x2c] sm:$0xf0] }
  0x3d   :  { %587 = vmatpush.bf16.msrb.mxu1 %v850_v54  ;;  %v762_v52 = vor.u32 %v902_v50, %v761_v49  ;;  %v769_v54 = vld [vmem:[#allocation8 + $0x28] sm:$0xf] }
  0x3e   :  { %600 = vmatpush.bf16.msrb.mxu2 %v870_v45  ;;  %v786_v45 = vor.u32 %v907_v43, %v785_v42  ;;  %v770_v57 = vor.u32 %v903_v55, %v769_v54 }
  0x40   :  { %574 = vmatpush.bf16.msrb.mxu0 %v830_v2  ;;  %v753_v2 = vld [vmem:[#allocation8 + $0x8] sm:$0xf] }
  0x41   :  { %588 = vmatpush.bf16.msrb.mxu1 %v834_v3  ;;  %v899_v3 = vld [vmem:[#allocation8 + $0x14] sm:$0xf0] }
  0x42   :  { %601 = vmatpush.bf16.msrb.mxu2 %v854_v58  ;;  %v901_v58 = vld [vmem:[#allocation8 + $0x2c] sm:$0xf]  ;;  %v754_v5 = vor.u32 %v899_v3, %v753_v2 }
  0x43   :  { %v774_v60 = vor.u32 %v901_v58, %v771_v59 }
  0x44   :  { %575 = vmatpush.bf16.msrb.mxu0 %v814_v14 }
  0x45   :  { %589 = vmatpush.bf16.msrb.mxu1 %v818_v15 }
  0x46   :  { %602 = vmatpush.bf16.msrb.mxu2 %v838_v7  ;;  %v755_v7 = vld [vmem:[#allocation8 + $0x18] sm:$0xf0] }
  0x47   :  { %v758_v8 = vor.u32 %v897_v6, %v755_v7 }
  0x49   :  { %590 = vmatpush.bf16.msrb.mxu1 %v802_v33 }
  0x4a   :  { %603 = vmatpush.bf16.msrb.mxu2 %v822_v16 }
  0x4d   :  { %591 = vmatpush.bf16.msrb.mxu1 %v786_v45 }
  0x4e   :  { %604 = vmatpush.bf16.msrb.mxu2 %v806_v36 }
  0x51   :  { %592 = vmatpush.bf16.msrb.mxu1 %v770_v57 }
  0x52   :  { %605 = vmatpush.bf16.msrb.mxu2 %v790_v48 }
  0x55   :  { %593 = vmatpush.bf16.msrb.mxu1 %v754_v5 }
  0x56   :  { %606 = vmatpush.bf16.msrb.mxu2 %v774_v60 }
  0x5a   :  { %607 = vmatpush.bf16.msrb.mxu2 %v758_v8 }
  0xb4   :  { %v180_v21 = vpop.f32.mrf.mxu0 }
  0xb5   :  { %v181_v23 = vadd.f32 %v940_v22, %v180_v21 }
  0xb7   :  { %v185_v26 = vmax.f32 %v181_v23, 0.0 }
  0xbc   :  { %v182_v24 = vpop.f32.mrf.mxu0 }
  0xbd   :  { %v183_v25 = vadd.f32 %v940_v22, %v182_v24 }
  0xbf   :  { %v186_v27 = vmax.f32 %v183_v25, 0.0  ;;  %v793_v25 = vld [vmem:[#allocation8 + $0x60] sm:$0xf] }
  0xc1   :  { %v187_v28 = vpack.c.bf16 %v186_v27, %v185_v26  ;;  %v910_v26 = vld [vmem:[#allocation8 + $0x6c] sm:$0xf0]  ;;  %v908_v27 = vld [vmem:[#allocation8 + $0x64] sm:$0xf] }
  0xc2   :  { %v798_v32 = vor.u32 %v908_v27, %v795_v29 }
  0xc3   :  { %262 = vmatmul.bf16.vlgmr.msra.gmra.mxu1 %v187_v28  ;;  %v794_v28 = vor.u32 %v910_v26, %v793_v25 }
  0xc4   :  { %576 = vmatpush.bf16.msrb.mxu0 %v798_v32 }
  0xc5   :  { %562 = vmatpush.bf16.msra.mxu3 %v794_v28 }
  0xc8   :  { %577 = vmatpush.bf16.msrb.mxu0 %v782_v44 }
  0xc9   :  { %563 = vmatpush.bf16.msra.mxu3 %v778_v40 }
  0xcc   :  { %578 = vmatpush.bf16.msrb.mxu0 %v766_v56 }
  0xcd   :  { %564 = vmatpush.bf16.msra.mxu3 %v762_v52 }
  0xd0   :  { %579 = vmatpush.bf16.msrb.mxu0 %v750_v4 }
  0xd1   :  { %565 = vmatpush.bf16.msra.mxu3 %v746_v0 }
 0x140   :  { %v263_v17 = vpop.f32.mrf.mxu1 }
 0x141   :  { %v264_v19 = vadd.f32 %v941_v18, %v263_v17  ;;  %v388_v17 = vld [vmem:[#allocation10 + $0x3] ss:$4 sm:$0xf] }
 0x142   :  { %v393_v25 = vperm.slane %v388_v17, 3 }
 0x143   :  { %v268_v22 = vmax.f32 %v264_v19, 0.0  ;;  %v392_v19 = vperm.slane %v388_v17, 2 }
 0x148   :  { %v265_v20 = vpop.f32.mrf.mxu1 }
 0x149   :  { %v266_v21 = vadd.f32 %v941_v18, %v265_v20  ;;  %v391_v18 = vperm.slane %v388_v17, 1 }
 0x14b   :  { %v269_v23 = vmax.f32 %v266_v21, 0.0 }
 0x14d   :  { %v270_v24 = vpack.c.bf16 %v269_v23, %v268_v22 }
 0x14f   :  { %346 = vmatmul.bf16.vlgmr.msra.gmra.mxu2 %v270_v24  ;;  %v390_v24 = vperm.slane %v388_v17, 0 }
 0x1d2   :  { %v347_v9 = vpop.f32.mrf.mxu2 }
 0x1d3   :  { %v348_v11 = vadd.f32 %v942_v10, %v347_v9 }
 0x1d5   :  { %v352_v14 = vmax.f32 %v348_v11, 0.0 }
 0x1da   :  { %v349_v12 = vpop.f32.mrf.mxu2 }
 0x1db   :  { %v350_v13 = vadd.f32 %v942_v10, %v349_v12 }
 0x1dd   :  { %v353_v15 = vmax.f32 %v350_v13, 0.0 }
 0x1df   :  { %v354_v16 = vpack.c.bf16 %v353_v15, %v352_v14 }
 0x1e1   :  { %566 = vmatmul.bf16.vlgmr.msra.gmra.mxu3 %v354_v16  ;;  %580 = vmatmul.bf16.vlgmr.msrb.gmra.mxu0 %v354_v16 }
 0x1e2   :  { %594 = vmatmul.bf16.vlgmr.msrb.gmra.mxu1 %v354_v16  ;;  %608 = vmatmul.bf16.vlgmr.msrb.gmra.mxu2 %v354_v16 }
 0x25e   :  { %v581_v20 = vpop.f32.mrf.mxu0 }
 0x25f   :  { %v582_v21 = vadd.f32 %v581_v20, %v391_v18  ;;  %v595_v22 = vpop.f32.mrf.mxu1 }
 0x260   :  { %v596_v23 = vadd.f32 %v595_v22, %v392_v19 }
 0x261   :  { %615 = vst [vmem:[#allocation11 + $0x8] sm:$0xff] %v582_v21 }
 0x262   :  { %616 = vst [vmem:[#allocation11 + $0x10] sm:$0xff] %v596_v23 }
 0x264   :  { %v567_v26 = vpop.f32.mrf.mxu3 }
 0x265   :  { %v568_v27 = vadd.f32 %v567_v26, %v390_v24  ;;  %v609_v28 = vpop.f32.mrf.mxu2 }
 0x266   :  { %v610_v29 = vadd.f32 %v609_v28, %v393_v25  ;;  %v583_v30 = vpop.f32.mrf.mxu0 }
 0x267   :  { %614 = vst [vmem:[#allocation11] sm:$0xff] %v568_v27  ;;  %v584_v31 = vadd.f32 %v583_v30, %v391_v18  ;;  %v597_v32 = vpop.f32.mrf.mxu1 }
 0x268   :  { %617 = vst [vmem:[#allocation11 + $0x18] sm:$0xff] %v610_v29  ;;  %v598_v33 = vadd.f32 %v597_v32, %v392_v19 }
 0x269   :  { %619 = vst [vmem:[#allocation11 + $0x28] sm:$0xff] %v584_v31 }
 0x26a   :  { %620 = vst [vmem:[#allocation11 + $0x30] sm:$0xff] %v598_v33 }
 0x26c   :  { %v569_v34 = vpop.f32.mrf.mxu3 }
 0x26d   :  { %v570_v35 = vadd.f32 %v569_v34, %v390_v24  ;;  %v611_v36 = vpop.f32.mrf.mxu2 }
 0x26e   :  { %v612_v37 = vadd.f32 %v611_v36, %v393_v25 }
 0x26f   :  { %618 = vst [vmem:[#allocation11 + $0x20] sm:$0xff] %v570_v35 }
 0x270   :  { %621 = vst [vmem:[#allocation11 + $0x38] sm:$0xff] %v612_v37 }
 0x271   :  { %634 = dma.vmem_to_hbm [thread:$0]  %s627_s4, 1024, %s629_s21, [#allocation4], %s1105_s22, %s1105_s22, %s1106_s23  }
 0x272   :  { %1093 = dma.done.wait [#allocation4], 1024  }
 0x273   :  { %1094 = vsyncadd [#allocation4], 4294966272 }
 0x274   :  { %639 = vsyncpa [#allocation3], 1 }
 0x275   :  { %640 = vsyncpa [#allocation6], 1 }
 0x276   :  { %641 = vsyncpa [#allocation9], 1 }
 0x277   :  { %642 = vsyncpa [#allocation4], 1 }

</bundles_post_ra>
